<compile_context>
chip_gen: v7x
topology: tpu7x:2x2x1
jax: 0.10.0
libtpu: 0.0.40
codegen_flags: <defaults>
</compile_context>

<pallas_src>
import functools

import jax
import jax.numpy as jnp
from jax.experimental import pallas as pl
from jax.experimental.pallas import tpu as pltpu

MAX_CAP_LENGTH = 20

# Tile maxima for the two "wide output" kernels.  Module-level constants so the
# one-time weight prep (prepare_params) and the per-call wrappers agree on the
# padded shapes.
DEC_TN_MAX = 2048   # vocab-axis tile of the decoder projection
ANS_TN_MAX = 256    # answers-axis tile of logit_fc (minimises padding of ~3k answers)


# ----------------------------------------------------------------------------
# Small helpers
# ----------------------------------------------------------------------------
def _round_up(x, m):
    return (x + m - 1) // m * m


def _pad_axis(x, target, axis):
    pad = target - x.shape[axis]
    if pad == 0:
        return x
    widths = [(0, 0)] * x.ndim
    widths[axis] = (0, pad)
    return jnp.pad(x, widths)


def _pick_tn(n, tn_max):
    """Lane-axis tile + padded extent (padded extent is a multiple of tn)."""
    tn = min(tn_max, _round_up(n, 128))
    return tn, _round_up(n, tn)


def _pick_tm(m, tm_max):
    """Row tile: multiple of 8, capped at ~half the rows so the row axis has
    >=2 tiles whenever possible (both v7x TensorCores get work)."""
    return max(8, min(tm_max, _round_up(m, 8), _round_up(pl.cdiv(m, 2), 8)))


# ----------------------------------------------------------------------------
# Kernel 1: generic tiled matmul + bias  (out = x @ W + b)
#   grid = (N_tiles, M_tiles): the weight block index only depends on the OUTER
#   axis, so the (possibly huge, e.g. HIDxVOCAB) weight is streamed from HBM
#   exactly once while the tiny activation tiles are re-fetched per N tile.
#   K (hidden dim <= ~2048) is kept untiled: no accumulator scratch needed.
# ----------------------------------------------------------------------------
def _matmul_bias_kernel(x_ref, w_ref, b_ref, o_ref):
    acc = jnp.dot(x_ref[...], w_ref[...], preferred_element_type=jnp.float32)
    o_ref[...] = (acc + b_ref[...]).astype(o_ref.dtype)


def pallas_matmul_bias(x, w_pad, b_pad, n_out, out_dtype=jnp.bfloat16,
                       tm_max=256, tn_max=DEC_TN_MAX):
    """x: (M, K) -> (x @ w + b)[:, :n_out].

    w_pad (K, Np) bf16 and b_pad (1, Np) f32 are pre-padded ONCE outside jit
    (prepare_params); Np is a multiple of the tn chosen here by construction.

    VMEM budget at production shapes (K=768, tn=2048, tm=256, bf16 in/out):
    weight 2x3.1 MB + out 2x1 MB + act 2x0.4 MB ~= 9 MB -- fits the 16 MiB
    default scoped VMEM on v5e and the 32 MiB default on v6e/v7x.
    (pl.Buffered(3) on the weight spec is an optional v6e/v7x tweak if xprof
    shows DMA gaps; skipped to stay inside v5e's 16 MiB default.)
    """
    M, K = x.shape
    Kw, Np = w_pad.shape
    assert K == Kw
    tn = min(tn_max, Np)
    assert Np % tn == 0
    tm = _pick_tm(M, tm_max)
    Mp = _round_up(M, tm)

    xp = _pad_axis(x.astype(jnp.bfloat16), Mp, 0)

    out = pl.pallas_call(
        _matmul_bias_kernel,
        out_shape=jax.ShapeDtypeStruct((Mp, Np), out_dtype),
        grid=(Np // tn, Mp // tm),                      # N outer: weight streams once
        in_specs=[
            pl.BlockSpec((tm, K), lambda j, i: (i, 0)),
            pl.BlockSpec((K, tn), lambda j, i: (0, j)),
            pl.BlockSpec((1, tn), lambda j, i: (0, j)),
        ],
        out_specs=pl.BlockSpec((tm, tn), lambda j, i: (i, j)),
        compiler_params=pltpu.CompilerParams(
            dimension_semantics=("parallel", "parallel")),
    )(xp, w_pad, b_pad)
    return out[:M, :n_out]


# ----------------------------------------------------------------------------
# Kernel 2: fused visual projection + mean over objects
#   ctx[b] = mean_o( feat[b,o] @ W_feat + pos[b,o] @ W_pos + b_vis )
# The per-object (B, O, HID) projection never hits HBM (its only consumer in
# this forward is the mean-attention context).  The K=4 box projection is done
# as 4 unrolled VPU multiply-accumulates (free filler under the MXU matmul).
# ----------------------------------------------------------------------------
def _vis_ctx_kernel(feat_ref, pos_ref, wf_ref, wp_ref, b_ref, o_ref, *, num_obj):
    tb, hp = o_ref.shape
    # Visual-feature projection on the MXU.  feat stays f32 in HBM and is cast
    # to bf16 in-kernel (single f32 read; no separate XLA cast pass).
    acc = jnp.dot(feat_ref[...].astype(jnp.bfloat16), wf_ref[...],
                  preferred_element_type=jnp.float32)              # (tb*O, Hp) f32
    posv = pos_ref[...]                                            # (tb*O, 4) f32
    for k in range(pos_ref.shape[1]):                              # K=4 on the VPU
        acc = acc + posv[:, k:k + 1] * wp_ref[k:k + 1, :]
    # Fused mean over objects (sublane-group reduction).
    ctx = jnp.sum(acc.reshape(tb, num_obj, hp), axis=1) * (1.0 / num_obj)
    o_ref[...] = (ctx + b_ref[...]).astype(o_ref.dtype)


def pallas_visual_ctx(feat, pos, w_feat_pad, w_pos_pad, b_vis_pad, hid, tb_max=8):
    """feat: (B, O, F) f32, pos: (B, O, 4) f32 -> (B, hid) f32 mean context."""
    B, O, F = feat.shape
    P = pos.shape[2]
    Hp = w_feat_pad.shape[1]
    tb = _pick_tm(B, tb_max)
    Bp = _round_up(B, tb)

    featp = _pad_axis(feat, Bp, 0).reshape(Bp * O, F)              # f32, cast in-kernel
    posp = _pad_axis(pos.astype(jnp.float32), Bp, 0).reshape(Bp * O, P)

    out = pl.pallas_call(
        functools.partial(_vis_ctx_kernel, num_obj=O),
        out_shape=jax.ShapeDtypeStruct((Bp, Hp), jnp.float32),
        grid=(Bp // tb,),
        in_specs=[
            pl.BlockSpec((tb * O, F), lambda i: (i, 0)),
            pl.BlockSpec((tb * O, P), lambda i: (i, 0)),
            pl.BlockSpec((F, Hp), lambda i: (0, 0)),
            pl.BlockSpec((P, Hp), lambda i: (0, 0)),
            pl.BlockSpec((1, Hp), lambda i: (0, 0)),
        ],
        out_specs=pl.BlockSpec((tb, Hp), lambda i: (i, 0)),
        compiler_params=pltpu.CompilerParams(dimension_semantics=("parallel",)),
    )(featp, posp, w_feat_pad, w_pos_pad, b_vis_pad)
    return out[:B, :hid]


# ----------------------------------------------------------------------------
# Kernel 3: fused BERT pooler + logit_fc
#   x  = tanh(cls @ W_pool + b_pool)
#   h  = LayerNorm(erf-GeLU(x @ W1 + b1)) * gamma + beta       (f32 math)
#   out[:, j-tile] = h @ W2[:, j-tile] + b2[j-tile]
# The LayerNorm'd hidden is computed once per batch tile (answers tile j == 0),
# cached in a VMEM scratch, and reused while the answers axis is tiled.
# ----------------------------------------------------------------------------
def _pooled_logit_kernel(cls_ref, wp_ref, bp_ref, w1_ref, b1_ref, g_ref, bt_ref,
                         w2_ref, b2_ref, o_ref, h_ref):
    @pl.when(pl.program_id(1) == 0)
    def _():
        x = jnp.dot(cls_ref[...], wp_ref[...], preferred_element_type=jnp.float32)
        x = jnp.tanh(x + bp_ref[...])
        h = jnp.dot(x.astype(jnp.bfloat16), w1_ref[...],
                    preferred_element_type=jnp.float32) + b1_ref[...]
        # BERT GeLU (erf-based), f32 math (v5e has no bf16 VPU/EUP).
        h = 0.5 * h * (1.0 + jax.lax.erf(h * 0.7071067811865476))
        # BertLayerNorm, eps=1e-12, over the 2*HID axis.
        mu = jnp.mean(h, axis=-1, keepdims=True)
        var = jnp.mean(jnp.square(h - mu), axis=-1, keepdims=True)
        h = (h - mu) * jax.lax.rsqrt(var + 1e-12)
        h = h * g_ref[...] + bt_ref[...]
        h_ref[...] = h.astype(jnp.bfloat16)

    out = jnp.dot(h_ref[...], w2_ref[...], preferred_element_type=jnp.float32)
    o_ref[...] = (out + b2_ref[...]).astype(o_ref.dtype)


def pallas_pooled_logit_fc(cls_emb, w_pool, b_pool, w1, b1, gamma, beta,
                           w2_pad, b2_pad, num_answers, tm_max=256,
                           tn_max=ANS_TN_MAX):
    """cls_emb: (B, H) -> (B, num_answers) f32 VQA logits.

    w2_pad (2H, Ap) bf16 / b2_pad (1, Ap) f32 are pre-padded outside jit.
    VMEM at production (H=768, H2=1536, tn=256, tm=16): ~8.5 MB < 16 MiB (v5e).
    """
    B, H = cls_emb.shape
    H2 = w1.shape[1]
    Ap = w2_pad.shape[1]
    tn = min(tn_max, Ap)
    assert Ap % tn == 0
    tm = _pick_tm(B, tm_max)        # >=2 batch tiles when B > 8 (v7x megacore)
    Bp = _round_up(B, tm)

    clsp = _pad_axis(cls_emb.astype(jnp.bfloat16), Bp, 0)

    out = pl.pallas_call(
        _pooled_logit_kernel,
        out_shape=jax.ShapeDtypeStruct((Bp, Ap), jnp.float32),
        grid=(Bp // tm, Ap // tn),                 # answers axis innermost
        in_specs=[
            pl.BlockSpec((tm, H), lambda i, j: (i, 0)),
            pl.BlockSpec((H, H), lambda i, j: (0, 0)),
            pl.BlockSpec((1, H), lambda i, j: (0, 0)),
            pl.BlockSpec((H, H2), lambda i, j: (0, 0)),
            pl.BlockSpec((1, H2), lambda i, j: (0, 0)),
            pl.BlockSpec((1, H2), lambda i, j: (0, 0)),
            pl.BlockSpec((1, H2), lambda i, j: (0, 0)),
            pl.BlockSpec((H2, tn), lambda i, j: (0, j)),
            pl.BlockSpec((1, tn), lambda i, j: (0, j)),
        ],
        out_specs=pl.BlockSpec((tm, tn), lambda i, j: (i, j)),
        scratch_shapes=[pltpu.VMEM((tm, H2), jnp.bfloat16)],
        compiler_params=pltpu.CompilerParams(
            dimension_semantics=("parallel", "arbitrary")),
    )(clsp,
      w_pool.astype(jnp.bfloat16), b_pool.astype(jnp.float32).reshape(1, H),
      w1.astype(jnp.bfloat16), b1.astype(jnp.float32).reshape(1, H2),
      gamma.astype(jnp.float32).reshape(1, H2),
      beta.astype(jnp.float32).reshape(1, H2),
      w2_pad, b2_pad)
    return out[:B, :num_answers]


# ----------------------------------------------------------------------------
# Parameter construction (BERT-style init: N(0, 0.02), zero bias) and one-time
# kernel-ready prep (pad/cast the big slabs OUTSIDE jit).
# ----------------------------------------------------------------------------
def init_params(key, feat_dim, hid_dim, vocab, num_answers):
    ks = jax.random.split(key, 8)

    def n(k, shape, dtype=jnp.bfloat16):
        return (0.02 * jax.random.normal(k, shape, jnp.float32)).astype(dtype)

    return {
        # LXRT-encoder stand-in
        "emb": n(ks[0], (vocab, hid_dim), jnp.float32),   # token embedding
        "w_feat": n(ks[1], (feat_dim, hid_dim)),          # visual feat projection
        "w_pos": n(ks[6], (4, hid_dim)),                  # box projection
        "b_vis": jnp.zeros((hid_dim,), jnp.float32),
        "w_pool": n(ks[2], (hid_dim, hid_dim)),           # BERT pooler
        "b_pool": jnp.zeros((hid_dim,), jnp.float32),
        # logit_fc
        "w1": n(ks[3], (hid_dim, 2 * hid_dim)),
        "b1": jnp.zeros((2 * hid_dim,), jnp.float32),
        "gamma": jnp.ones((2 * hid_dim,), jnp.float32),
        "beta": jnp.zeros((2 * hid_dim,), jnp.float32),
        "w2": n(ks[4], (2 * hid_dim, num_answers)),
        "b2": jnp.zeros((num_answers,), jnp.float32),
        # decoder vocab projection
        "w_dec": n(ks[5], (hid_dim, vocab)),
        "b_dec": jnp.zeros((vocab,), jnp.float32),
    }


def prepare_params(params):
    """One-time (outside jit) kernel-ready prep: pads/casts the large weight
    slabs so no jnp.pad of ~46 MB tensors runs inside the jit'd forward."""
    H = params["w_pool"].shape[0]
    H2 = params["w1"].shape[1]
    A = params["w2"].shape[1]
    V = params["w_dec"].shape[1]
    Hp = _round_up(H, 128)
    _, Ap = _pick_tn(A, ANS_TN_MAX)
    _, Vp = _pick_tn(V, DEC_TN_MAX)

    drop = ("w_feat", "w_pos", "b_vis", "w2", "w_dec", "b_dec")
    p = {k: v for k, v in params.items() if k not in drop}
    p["w_feat_p"] = _pad_axis(params["w_feat"].astype(jnp.bfloat16), Hp, 1)
    p["w_pos_p"] = _pad_axis(params["w_pos"].astype(jnp.float32), Hp, 1)   # f32: VPU MACs
    p["b_vis_p"] = _pad_axis(params["b_vis"].astype(jnp.float32).reshape(1, H), Hp, 1)
    p["w2_p"] = _pad_axis(params["w2"].astype(jnp.bfloat16), Ap, 1)
    p["b2_p"] = _pad_axis(params["b2"].astype(jnp.float32).reshape(1, A), Ap, 1)
    p["w_dec_p"] = _pad_axis(params["w_dec"].astype(jnp.bfloat16), Vp, 1)
    p["b_dec_p"] = _pad_axis(params["b_dec"].astype(jnp.float32).reshape(1, V), Vp, 1)
    return p


# ----------------------------------------------------------------------------
# CAPModel.forward equivalent
# ----------------------------------------------------------------------------
@jax.jit
def cap_model_forward(params, feat, pos, input_id):
    """feat: (B, O, F) f32, pos: (B, O, 4) f32, input_id: (B, SEQ) int32.

    Returns (logit, predictions, input_id, predictions) matching the PyTorch
    module's return tuple.  `params` must come from prepare_params().
    """
    B, O, F = feat.shape
    SEQ = input_id.shape[1]
    HID = params["w_pool"].shape[0]
    VOCAB = params["emb"].shape[0]
    NUM_ANSWERS = params["b2"].shape[0]

    # ---- LXRTEncoder stand-in --------------------------------------------
    # TODO(synk): the full LXMERT cross-modal transformer is an external module;
    # stand-in = visual (feat, pos) projection + token-embedding language stream
    # + BERT pooler on the [CLS] position. String tokenization of `sent` has no
    # kernel equivalent; token ids are taken as input directly.
    emb = jnp.take(params["emb"], input_id, axis=0)        # (B, SEQ, HID) f32

    # ---- BERT pooler + logit_fc (one fused tiled kernel) ------------------
    logit = pallas_pooled_logit_fc(
        emb[:, 0, :], params["w_pool"], params["b_pool"],
        params["w1"], params["b1"], params["gamma"], params["beta"],
        params["w2_p"], params["b2_p"], NUM_ANSWERS)

    # ---- DecoderWithAttention stand-in -------------------------------------
    # TODO(synk): the attention-LSTM caption decoder (Show-Attend-Tell) is
    # replaced by a single-step mean-attention over projected visual features
    # followed by the vocab projection (dominant cost, done in Pallas).  The
    # per-object projection + mean is fused into one kernel so (B, O, HID)
    # never round-trips HBM.
    ctx = pallas_visual_ctx(feat, pos, params["w_feat_p"], params["w_pos_p"],
                            params["b_vis_p"], HID)         # (B, HID) f32

    # Elementwise prologue stays in XLA: fusing it into the vocab kernel would
    # fragment the M axis per batch row; its HBM traffic is <2% of the vocab matmul.
    h = jnp.tanh(emb + ctx[:, None, :]).reshape(B * SEQ, HID)
    predictions = pallas_matmul_bias(
        h, params["w_dec_p"], params["b_dec_p"], VOCAB,
        out_dtype=jnp.bfloat16,    # bf16 logits: halves the dominant HBM writeback
    ).reshape(B, SEQ, VOCAB)

    return logit, predictions, input_id, predictions


# ----------------------------------------------------------------------------
if __name__ == "__main__":
    B, O, F = 2, 8, 64            # batch, objects, visual feature size
    HID = 32                      # lxrt_encoder.dim (scaled down)
    NUM_ANSWERS = 16
    VOCAB = 128                   # scaled down from 30000
    SEQ = MAX_CAP_LENGTH          # 20

    key = jax.random.PRNGKey(0)
    k_feat, k_pos, k_sent, k_par = jax.random.split(key, 4)

    feat = jax.random.normal(k_feat, (B, O, F), jnp.float32)
    pos = jax.random.uniform(k_pos, (B, O, 4), jnp.float32)
    # deterministic stand-in for tokenized `sent` (list of strings in PyTorch)
    input_id = jax.random.randint(k_sent, (B, SEQ), 0, VOCAB, dtype=jnp.int32)

    params = prepare_params(init_params(k_par, F, HID, VOCAB, NUM_ANSWERS))

    logit, predictions, out_ids, predictions_again = cap_model_forward(
        params, feat, pos, input_id)
    jax.block_until_ready((logit, predictions, out_ids, predictions_again))

    assert logit.shape == (B, NUM_ANSWERS)
    assert predictions.shape == (B, SEQ, VOCAB)
    assert out_ids.shape == (B, SEQ)
    assert bool(jnp.all(jnp.isfinite(logit))) and bool(
        jnp.all(jnp.isfinite(predictions.astype(jnp.float32))))

    print("KERNEL_OK")
</pallas_src>

<mosaic_0001>
module attributes {stable_mosaic.version = 11 : i64} {
  func.func @_vis_ctx_kernel(%arg0: i32, %arg1: memref<64x64xf32, #tpu.memory_space<vmem>>, %arg2: memref<64x4xf32, #tpu.memory_space<vmem>>, %arg3: memref<64x128xbf16, #tpu.memory_space<vmem>>, %arg4: memref<4x128xf32, #tpu.memory_space<vmem>>, %arg5: memref<1x128xf32, #tpu.memory_space<vmem>>, %arg6: memref<8x128xf32, #tpu.memory_space<vmem>>) attributes {dimension_semantics = [#tpu.dimension_semantics<parallel>], iteration_bounds = array<i64: 1>, scalar_prefetch = 0 : i64, scratch_operands = 0 : i64, tpu.core_type = #tpu.core_type<tc>, window_params = [{transform_indices = @transform_0, window_bounds = array<i64: 64, 64>}, {transform_indices = @transform_1, window_bounds = array<i64: 64, 4>}, {pipeline_mode = #tpu.pipeline_mode<synchronous>, transform_indices = @transform_2, window_bounds = array<i64: 64, 128>}, {pipeline_mode = #tpu.pipeline_mode<synchronous>, transform_indices = @transform_3, window_bounds = array<i64: 4, 128>}, {pipeline_mode = #tpu.pipeline_mode<synchronous>, transform_indices = @transform_4, window_bounds = array<i64: 1, 128>}, {transform_indices = @transform_5, window_bounds = array<i64: 8, 128>}]} {
    %c0 = arith.constant 0 : index
    %c0_0 = arith.constant 0 : index
    %0 = vector.load %arg1[%c0, %c0_0] : memref<64x64xf32, #tpu.memory_space<vmem>>, vector<64x64xf32>
    %1 = arith.truncf %0 : vector<64x64xf32> to vector<64x64xbf16>
    %c0_1 = arith.constant 0 : index
    %c0_2 = arith.constant 0 : index
    %2 = vector.load %arg3[%c0_1, %c0_2] : memref<64x128xbf16, #tpu.memory_space<vmem>>, vector<64x128xbf16>
    %cst = arith.constant dense<0.000000e+00> : vector<64x128xf32>
    %3 = tpu.matmul %1, %2, %cst {dimension_numbers = #tpu.dot_dimension_numbers<[1], [0], [0], [1], [0, 0, 1, 1], [], []>} : vector<64x64xbf16>, vector<64x128xbf16>, vector<64x128xf32> -> vector<64x128xf32>
    %c0_3 = arith.constant 0 : index
    %c0_4 = arith.constant 0 : index
    %4 = vector.load %arg2[%c0_3, %c0_4] : memref<64x4xf32, #tpu.memory_space<vmem>>, vector<64x4xf32>
    %5 = vector.extract_strided_slice %4 {offsets = [0, 0], sizes = [64, 1], strides = [1, 1]} : vector<64x4xf32> to vector<64x1xf32>
    %c0_5 = arith.constant 0 : index
    %c0_6 = arith.constant 0 : index
    %6 = vector.load %arg4[%c0_5, %c0_6] : memref<4x128xf32, #tpu.memory_space<vmem>>, vector<1x128xf32>
    %7 = vector.broadcast %5 : vector<64x1xf32> to vector<64x128xf32>
    %8 = vector.broadcast %6 : vector<1x128xf32> to vector<64x128xf32>
    %9 = arith.mulf %7, %8 : vector<64x128xf32>
    %10 = arith.addf %3, %9 : vector<64x128xf32>
    %11 = vector.extract_strided_slice %4 {offsets = [0, 1], sizes = [64, 1], strides = [1, 1]} : vector<64x4xf32> to vector<64x1xf32>
    %c1 = arith.constant 1 : index
    %c0_7 = arith.constant 0 : index
    %12 = vector.load %arg4[%c1, %c0_7] : memref<4x128xf32, #tpu.memory_space<vmem>>, vector<1x128xf32>
    %13 = vector.broadcast %11 : vector<64x1xf32> to vector<64x128xf32>
    %14 = vector.broadcast %12 : vector<1x128xf32> to vector<64x128xf32>
    %15 = arith.mulf %13, %14 : vector<64x128xf32>
    %16 = arith.addf %10, %15 : vector<64x128xf32>
    %17 = vector.extract_strided_slice %4 {offsets = [0, 2], sizes = [64, 1], strides = [1, 1]} : vector<64x4xf32> to vector<64x1xf32>
    %c2 = arith.constant 2 : index
    %c0_8 = arith.constant 0 : index
    %18 = vector.load %arg4[%c2, %c0_8] : memref<4x128xf32, #tpu.memory_space<vmem>>, vector<1x128xf32>
    %19 = vector.broadcast %17 : vector<64x1xf32> to vector<64x128xf32>
    %20 = vector.broadcast %18 : vector<1x128xf32> to vector<64x128xf32>
    %21 = arith.mulf %19, %20 : vector<64x128xf32>
    %22 = arith.addf %16, %21 : vector<64x128xf32>
    %23 = vector.extract_strided_slice %4 {offsets = [0, 3], sizes = [64, 1], strides = [1, 1]} : vector<64x4xf32> to vector<64x1xf32>
    %c3 = arith.constant 3 : index
    %c0_9 = arith.constant 0 : index
    %24 = vector.load %arg4[%c3, %c0_9] : memref<4x128xf32, #tpu.memory_space<vmem>>, vector<1x128xf32>
    %25 = vector.broadcast %23 : vector<64x1xf32> to vector<64x128xf32>
    %26 = vector.broadcast %24 : vector<1x128xf32> to vector<64x128xf32>
    %27 = arith.mulf %25, %26 : vector<64x128xf32>
    %28 = arith.addf %22, %27 : vector<64x128xf32>
    %29 = vector.shape_cast %28 : vector<64x128xf32> to vector<8x8x128xf32>
    %cst_10 = arith.constant dense<0.000000e+00> : vector<8x128xf32>
    %30 = vector.multi_reduction <add>, %29, %cst_10 [1] : vector<8x8x128xf32> to vector<8x128xf32>
    %cst_11 = arith.constant 1.250000e-01 : f32
    %31 = vector.broadcast %cst_11 : f32 to vector<8x128xf32>
    %32 = arith.mulf %30, %31 : vector<8x128xf32>
    %c0_12 = arith.constant 0 : index
    %c0_13 = arith.constant 0 : index
    %33 = vector.load %arg5[%c0_12, %c0_13] : memref<1x128xf32, #tpu.memory_space<vmem>>, vector<1x128xf32>
    %34 = vector.broadcast %33 : vector<1x128xf32> to vector<8x128xf32>
    %35 = arith.addf %32, %34 : vector<8x128xf32>
    %c0_14 = arith.constant 0 : index
    %c0_15 = arith.constant 0 : index
    %36 = vector.load %arg6[%c0_14, %c0_15] : memref<8x128xf32, #tpu.memory_space<vmem>>, vector<8x128xf32>
    tpu.vector_store %arg6[%c0_14, %c0_15], %35 {strides = array<i32>} : memref<8x128xf32, #tpu.memory_space<vmem>>, vector<8x128xf32>,
    return
  }
  func.func @transform_0(%arg0: i32) -> (i32, i32) {
    %c0_i32 = arith.constant 0 : i32
    %c0_i32_0 = arith.constant 0 : i32
    return %arg0, %c0_i32 : i32, i32
  }
  func.func @transform_1(%arg0: i32) -> (i32, i32) {
    %c0_i32 = arith.constant 0 : i32
    %c0_i32_0 = arith.constant 0 : i32
    return %arg0, %c0_i32 : i32, i32
  }
  func.func @transform_2(%arg0: i32) -> (i32, i32) {
    %c0_i32 = arith.constant 0 : i32
    %c0_i32_0 = arith.constant 0 : i32
    %c0_i32_1 = arith.constant 0 : i32
    return %c0_i32, %c0_i32_0 : i32, i32
  }
  func.func @transform_3(%arg0: i32) -> (i32, i32) {
    %c0_i32 = arith.constant 0 : i32
    %c0_i32_0 = arith.constant 0 : i32
    %c0_i32_1 = arith.constant 0 : i32
    return %c0_i32, %c0_i32_0 : i32, i32
  }
  func.func @transform_4(%arg0: i32) -> (i32, i32) {
    %c0_i32 = arith.constant 0 : i32
    %c0_i32_0 = arith.constant 0 : i32
    %c0_i32_1 = arith.constant 0 : i32
    return %c0_i32, %c0_i32_0 : i32, i32
  }
  func.func @transform_5(%arg0: i32) -> (i32, i32) {
    %c0_i32 = arith.constant 0 : i32
    %c0_i32_0 = arith.constant 0 : i32
    return %arg0, %c0_i32 : i32, i32
  }
}

module attributes {stable_mosaic.version = 11 : i64} {
  func.func @_matmul_bias_kernel(%arg0: i32, %arg1: i32, %arg2: memref<24x32xbf16, #tpu.memory_space<vmem>>, %arg3: memref<32x128xbf16, #tpu.memory_space<vmem>>, %arg4: memref<1x128xf32, #tpu.memory_space<vmem>>, %arg5: memref<24x128xbf16, #tpu.memory_space<vmem>>) attributes {dimension_semantics = [#tpu.dimension_semantics<parallel>, #tpu.dimension_semantics<parallel>], iteration_bounds = array<i64: 1, 2>, scalar_prefetch = 0 : i64, scratch_operands = 0 : i64, tpu.core_type = #tpu.core_type<tc>, window_params = [{transform_indices = @transform_0, window_bounds = array<i64: 24, 32>}, {transform_indices = @transform_1, window_bounds = array<i64: 32, 128>}, {transform_indices = @transform_2, window_bounds = array<i64: 1, 128>}, {transform_indices = @transform_3, window_bounds = array<i64: 24, 128>}]} {
    %c0 = arith.constant 0 : index
    %c0_0 = arith.constant 0 : index
    %0 = vector.load %arg2[%c0, %c0_0] : memref<24x32xbf16, #tpu.memory_space<vmem>>, vector<24x32xbf16>
    %c0_1 = arith.constant 0 : index
    %c0_2 = arith.constant 0 : index
    %1 = vector.load %arg3[%c0_1, %c0_2] : memref<32x128xbf16, #tpu.memory_space<vmem>>, vector<32x128xbf16>
    %cst = arith.constant dense<0.000000e+00> : vector<24x128xf32>
    %2 = tpu.matmul %0, %1, %cst {dimension_numbers = #tpu.dot_dimension_numbers<[1], [0], [0], [1], [0, 0, 1, 1], [], []>} : vector<24x32xbf16>, vector<32x128xbf16>, vector<24x128xf32> -> vector<24x128xf32>
    %c0_3 = arith.constant 0 : index
    %c0_4 = arith.constant 0 : index
    %3 = vector.load %arg4[%c0_3, %c0_4] : memref<1x128xf32, #tpu.memory_space<vmem>>, vector<1x128xf32>
    %4 = vector.broadcast %3 : vector<1x128xf32> to vector<24x128xf32>
    %5 = arith.addf %2, %4 : vector<24x128xf32>
    %6 = arith.truncf %5 : vector<24x128xf32> to vector<24x128xbf16>
    %c0_5 = arith.constant 0 : index
    %c0_6 = arith.constant 0 : index
    %7 = vector.load %arg5[%c0_5, %c0_6] : memref<24x128xbf16, #tpu.memory_space<vmem>>, vector<24x128xbf16>
    tpu.vector_store %arg5[%c0_5, %c0_6], %6 {strides = array<i32>} : memref<24x128xbf16, #tpu.memory_space<vmem>>, vector<24x128xbf16>,
    return
  }
  func.func @transform_0(%arg0: i32, %arg1: i32) -> (i32, i32) {
    %c0_i32 = arith.constant 0 : i32
    %c0_i32_0 = arith.constant 0 : i32
    return %arg1, %c0_i32 : i32, i32
  }
  func.func @transform_1(%arg0: i32, %arg1: i32) -> (i32, i32) {
    %c0_i32 = arith.constant 0 : i32
    %c0_i32_0 = arith.constant 0 : i32
    return %c0_i32, %arg0 : i32, i32
  }
  func.func @transform_2(%arg0: i32, %arg1: i32) -> (i32, i32) {
    %c0_i32 = arith.constant 0 : i32
    %c0_i32_0 = arith.constant 0 : i32
    return %c0_i32, %arg0 : i32, i32
  }
  func.func @transform_3(%arg0: i32, %arg1: i32) -> (i32, i32) {
    %c0_i32 = arith.constant 0 : i32
    return %arg1, %arg0 : i32, i32
  }
}

module attributes {stable_mosaic.version = 11 : i64} {
  func.func @_pooled_logit_kernel(%arg0: i32, %arg1: i32, %arg2: memref<8x32xbf16, #tpu.memory_space<vmem>>, %arg3: memref<32x32xbf16, #tpu.memory_space<vmem>>, %arg4: memref<1x32xf32, #tpu.memory_space<vmem>>, %arg5: memref<32x64xbf16, #tpu.memory_space<vmem>>, %arg6: memref<1x64xf32, #tpu.memory_space<vmem>>, %arg7: memref<1x64xf32, #tpu.memory_space<vmem>>, %arg8: memref<1x64xf32, #tpu.memory_space<vmem>>, %arg9: memref<64x128xbf16, #tpu.memory_space<vmem>>, %arg10: memref<1x128xf32, #tpu.memory_space<vmem>>, %arg11: memref<8x128xf32, #tpu.memory_space<vmem>>, %arg12: memref<8x64xbf16, #tpu.memory_space<vmem>>) attributes {dimension_semantics = [#tpu.dimension_semantics<parallel>, #tpu.dimension_semantics<arbitrary>], iteration_bounds = array<i64: 1, 1>, scalar_prefetch = 0 : i64, scratch_operands = 1 : i64, tpu.core_type = #tpu.core_type<tc>, window_params = [{transform_indices = @transform_0, window_bounds = array<i64: 8, 32>}, {pipeline_mode = #tpu.pipeline_mode<synchronous>, transform_indices = @transform_1, window_bounds = array<i64: 32, 32>}, {pipeline_mode = #tpu.pipeline_mode<synchronous>, transform_indices = @transform_2, window_bounds = array<i64: 1, 32>}, {pipeline_mode = #tpu.pipeline_mode<synchronous>, transform_indices = @transform_3, window_bounds = array<i64: 32, 64>}, {pipeline_mode = #tpu.pipeline_mode<synchronous>, transform_indices = @transform_4, window_bounds = array<i64: 1, 64>}, {pipeline_mode = #tpu.pipeline_mode<synchronous>, transform_indices = @transform_5, window_bounds = array<i64: 1, 64>}, {pipeline_mode = #tpu.pipeline_mode<synchronous>, transform_indices = @transform_6, window_bounds = array<i64: 1, 64>}, {transform_indices = @transform_7, window_bounds = array<i64: 64, 128>}, {transform_indices = @transform_8, window_bounds = array<i64: 1, 128>}, {transform_indices = @transform_9, window_bounds = array<i64: 8, 128>}]} {
    %c0_i32 = arith.constant 0 : i32
    %0 = arith.cmpi eq, %arg1, %c0_i32 : i32
    %1 = arith.extui %0 : i1 to i32
    %c0_i32_0 = arith.constant 0 : i32
    %2 = arith.cmpi ne, %1, %c0_i32_0 : i32
    scf.if %2 {
      %c0_8 = arith.constant 0 : index
      %c0_9 = arith.constant 0 : index
      %10 = vector.load %arg2[%c0_8, %c0_9] : memref<8x32xbf16, #tpu.memory_space<vmem>>, vector<8x32xbf16>
      %c0_10 = arith.constant 0 : index
      %c0_11 = arith.constant 0 : index
      %11 = vector.load %arg3[%c0_10, %c0_11] : memref<32x32xbf16, #tpu.memory_space<vmem>>, vector<32x32xbf16>
      %cst_12 = arith.constant dense<0.000000e+00> : vector<8x32xf32>
      %12 = tpu.matmul %10, %11, %cst_12 {dimension_numbers = #tpu.dot_dimension_numbers<[1], [0], [0], [1], [0, 0, 1, 1], [], []>} : vector<8x32xbf16>, vector<32x32xbf16>, vector<8x32xf32> -> vector<8x32xf32>
      %c0_13 = arith.constant 0 : index
      %c0_14 = arith.constant 0 : index
      %13 = vector.load %arg4[%c0_13, %c0_14] : memref<1x32xf32, #tpu.memory_space<vmem>>, vector<1x32xf32>
      %14 = vector.broadcast %13 : vector<1x32xf32> to vector<8x32xf32>
      %15 = arith.addf %12, %14 : vector<8x32xf32>
      %16 = math.tanh %15 : vector<8x32xf32>
      %17 = arith.truncf %16 : vector<8x32xf32> to vector<8x32xbf16>
      %c0_15 = arith.constant 0 : index
      %c0_16 = arith.constant 0 : index
      %18 = vector.load %arg5[%c0_15, %c0_16] : memref<32x64xbf16, #tpu.memory_space<vmem>>, vector<32x64xbf16>
      %cst_17 = arith.constant dense<0.000000e+00> : vector<8x64xf32>
      %19 = tpu.matmul %17, %18, %cst_17 {dimension_numbers = #tpu.dot_dimension_numbers<[1], [0], [0], [1], [0, 0, 1, 1], [], []>} : vector<8x32xbf16>, vector<32x64xbf16>, vector<8x64xf32> -> vector<8x64xf32>
      %c0_18 = arith.constant 0 : index
      %c0_19 = arith.constant 0 : index
      %20 = vector.load %arg6[%c0_18, %c0_19] : memref<1x64xf32, #tpu.memory_space<vmem>>, vector<1x64xf32>
      %21 = vector.broadcast %20 : vector<1x64xf32> to vector<8x64xf32>
      %22 = arith.addf %19, %21 : vector<8x64xf32>
      %cst_20 = arith.constant 5.000000e-01 : f32
      %23 = vector.broadcast %cst_20 : f32 to vector<8x64xf32>
      %24 = arith.mulf %23, %22 : vector<8x64xf32>
      %cst_21 = arith.constant 0.707106769 : f32
      %25 = vector.broadcast %cst_21 : f32 to vector<8x64xf32>
      %26 = arith.mulf %22, %25 : vector<8x64xf32>
      %27 = math.erf %26 : vector<8x64xf32>
      %cst_22 = arith.constant 1.000000e+00 : f32
      %28 = vector.broadcast %cst_22 : f32 to vector<8x64xf32>
      %29 = arith.addf %28, %27 : vector<8x64xf32>
      %30 = arith.mulf %24, %29 : vector<8x64xf32>
      %cst_23 = arith.constant dense<0.000000e+00> : vector<8xf32>
      %31 = vector.multi_reduction <add>, %30, %cst_23 [1] : vector<8x64xf32> to vector<8xf32>
      %32 = vector.shape_cast %31 : vector<8xf32> to vector<8x1xf32>
      %cst_24 = arith.constant 6.400000e+01 : f32
      %33 = vector.broadcast %cst_24 : f32 to vector<8x1xf32>
      %34 = arith.divf %32, %33 : vector<8x1xf32>
      %35 = vector.broadcast %34 : vector<8x1xf32> to vector<8x64xf32>
      %36 = arith.subf %30, %35 : vector<8x64xf32>
      %37 = arith.mulf %36, %36 : vector<8x64xf32>
      %cst_25 = arith.constant dense<0.000000e+00> : vector<8xf32>
      %38 = vector.multi_reduction <add>, %37, %cst_25 [1] : vector<8x64xf32> to vector<8xf32>
      %39 = vector.shape_cast %38 : vector<8xf32> to vector<8x1xf32>
      %cst_26 = arith.constant 6.400000e+01 : f32
      %40 = vector.broadcast %cst_26 : f32 to vector<8x1xf32>
      %41 = arith.divf %39, %40 : vector<8x1xf32>
      %42 = vector.broadcast %34 : vector<8x1xf32> to vector<8x64xf32>
      %43 = arith.subf %30, %42 : vector<8x64xf32>
      %cst_27 = arith.constant 9.99999996E-13 : f32
      %44 = vector.broadcast %cst_27 : f32 to vector<8x1xf32>
      %45 = arith.addf %41, %44 : vector<8x1xf32>
      %46 = math.rsqrt %45 : vector<8x1xf32>
      %47 = vector.broadcast %46 : vector<8x1xf32> to vector<8x64xf32>
      %48 = arith.mulf %43, %47 : vector<8x64xf32>
      %c0_28 = arith.constant 0 : index
      %c0_29 = arith.constant 0 : index
      %49 = vector.load %arg7[%c0_28, %c0_29] : memref<1x64xf32, #tpu.memory_space<vmem>>, vector<1x64xf32>
      %50 = vector.broadcast %49 : vector<1x64xf32> to vector<8x64xf32>
      %51 = arith.mulf %48, %50 : vector<8x64xf32>
      %c0_30 = arith.constant 0 : index
      %c0_31 = arith.constant 0 : index
      %52 = vector.load %arg8[%c0_30, %c0_31] : memref<1x64xf32, #tpu.memory_space<vmem>>, vector<1x64xf32>
      %53 = vector.broadcast %52 : vector<1x64xf32> to vector<8x64xf32>
      %54 = arith.addf %51, %53 : vector<8x64xf32>
      %55 = arith.truncf %54 : vector<8x64xf32> to vector<8x64xbf16>
      %c0_32 = arith.constant 0 : index
      %c0_33 = arith.constant 0 : index
      %56 = vector.load %arg12[%c0_32, %c0_33] : memref<8x64xbf16, #tpu.memory_space<vmem>>, vector<8x64xbf16>
      tpu.vector_store %arg12[%c0_32, %c0_33], %55 {strides = array<i32>} : memref<8x64xbf16, #tpu.memory_space<vmem>>, vector<8x64xbf16>,
    } else {
    }
    %c0 = arith.constant 0 : index
    %c0_1 = arith.constant 0 : index
    %3 = vector.load %arg12[%c0, %c0_1] : memref<8x64xbf16, #tpu.memory_space<vmem>>, vector<8x64xbf16>
    %c0_2 = arith.constant 0 : index
    %c0_3 = arith.constant 0 : index
    %4 = vector.load %arg9[%c0_2, %c0_3] : memref<64x128xbf16, #tpu.memory_space<vmem>>, vector<64x128xbf16>
    %cst = arith.constant dense<0.000000e+00> : vector<8x128xf32>
    %5 = tpu.matmul %3, %4, %cst {dimension_numbers = #tpu.dot_dimension_numbers<[1], [0], [0], [1], [0, 0, 1, 1], [], []>} : vector<8x64xbf16>, vector<64x128xbf16>, vector<8x128xf32> -> vector<8x128xf32>
    %c0_4 = arith.constant 0 : index
    %c0_5 = arith.constant 0 : index
    %6 = vector.load %arg10[%c0_4, %c0_5] : memref<1x128xf32, #tpu.memory_space<vmem>>, vector<1x128xf32>
    %7 = vector.broadcast %6 : vector<1x128xf32> to vector<8x128xf32>
    %8 = arith.addf %5, %7 : vector<8x128xf32>
    %c0_6 = arith.constant 0 : index
    %c0_7 = arith.constant 0 : index
    %9 = vector.load %arg11[%c0_6, %c0_7] : memref<8x128xf32, #tpu.memory_space<vmem>>, vector<8x128xf32>
    tpu.vector_store %arg11[%c0_6, %c0_7], %8 {strides = array<i32>} : memref<8x128xf32, #tpu.memory_space<vmem>>, vector<8x128xf32>,
    return
  }
  func.func @transform_0(%arg0: i32, %arg1: i32) -> (i32, i32) {
    %c0_i32 = arith.constant 0 : i32
    %c0_i32_0 = arith.constant 0 : i32
    return %arg0, %c0_i32 : i32, i32
  }
  func.func @transform_1(%arg0: i32, %arg1: i32) -> (i32, i32) {
    %c0_i32 = arith.constant 0 : i32
    %c0_i32_0 = arith.constant 0 : i32
    %c0_i32_1 = arith.constant 0 : i32
    return %c0_i32, %c0_i32_0 : i32, i32
  }
  func.func @transform_2(%arg0: i32, %arg1: i32) -> (i32, i32) {
    %c0_i32 = arith.constant 0 : i32
    %c0_i32_0 = arith.constant 0 : i32
    %c0_i32_1 = arith.constant 0 : i32
    return %c0_i32, %c0_i32_0 : i32, i32
  }
  func.func @transform_3(%arg0: i32, %arg1: i32) -> (i32, i32) {
    %c0_i32 = arith.constant 0 : i32
    %c0_i32_0 = arith.constant 0 : i32
    %c0_i32_1 = arith.constant 0 : i32
    return %c0_i32, %c0_i32_0 : i32, i32
  }
  func.func @transform_4(%arg0: i32, %arg1: i32) -> (i32, i32) {
    %c0_i32 = arith.constant 0 : i32
    %c0_i32_0 = arith.constant 0 : i32
    %c0_i32_1 = arith.constant 0 : i32
    return %c0_i32, %c0_i32_0 : i32, i32
  }
  func.func @transform_5(%arg0: i32, %arg1: i32) -> (i32, i32) {
    %c0_i32 = arith.constant 0 : i32
    %c0_i32_0 = arith.constant 0 : i32
    %c0_i32_1 = arith.constant 0 : i32
    return %c0_i32, %c0_i32_0 : i32, i32
  }
  func.func @transform_6(%arg0: i32, %arg1: i32) -> (i32, i32) {
    %c0_i32 = arith.constant 0 : i32
    %c0_i32_0 = arith.constant 0 : i32
    %c0_i32_1 = arith.constant 0 : i32
    return %c0_i32, %c0_i32_0 : i32, i32
  }
  func.func @transform_7(%arg0: i32, %arg1: i32) -> (i32, i32) {
    %c0_i32 = arith.constant 0 : i32
    %c0_i32_0 = arith.constant 0 : i32
    return %c0_i32, %arg1 : i32, i32
  }
  func.func @transform_8(%arg0: i32, %arg1: i32) -> (i32, i32) {
    %c0_i32 = arith.constant 0 : i32
    %c0_i32_0 = arith.constant 0 : i32
    return %c0_i32, %arg1 : i32, i32
  }
  func.func @transform_9(%arg0: i32, %arg1: i32) -> (i32, i32) {
    %c0_i32 = arith.constant 0 : i32
    return %arg0, %arg1 : i32, i32
  }
}

</mosaic_0001>

<bundles_post_ra>
// kernel: cap_model_forward.5
= control target key start
LH: loop header
LB: loop body
LE: loop exit
PB: predicated region body
PF: predicated region fallthrough
CT: control target
= control target key end

     0   :  { %s546_s12 = smov 0   ;;  %s548_s13 = smov 0   ;;  %s588_s0 = inlined_call_operand.vmem [shape: bf16[48,32], index: 0, kind: input, shape index: {}]   ;;  %s589_s1 = inlined_call_operand.vmem [shape: bf16[32,128], index: 1, kind: input, shape index: {}]   ;;  %s590_s2 = inlined_call_operand.vmem [shape: f32[1,128], index: 2, kind: input, shape index: {}]   ;;  %s591_s3 = inlined_call_operand.vmem [shape: bf16[48,128], index: 3, kind: output, shape index: {}]  }
   0x1   :  { %s550_s14 = smov 0  }
   0x2 LB: > { %s22_s15 = sadd.s32 1, %s520_s13  ;;  %p439_p0 = scmp.ge.s32.totalorder %s524_s14, 1  ;;  %s524_s14 = sphi %s550_s14, %s13_s14   ;;  %s520_s13 = sphi %s548_s13, %s593_s13   ;;  %s516_s12 = sphi %s546_s12, %s592_s12  }
   0x3   : > { %p23_p1 = scmp.ge.s32.totalorder %s22_s15, 2  ;;  %p169_p2 = scmp.lt.s32.totalorder %s524_s14, 3 }
   0x5   : > { %s595_s15 = smov (%p23_p1, %s22_s15), 0  ;;  %p170_p3 = pnand %p439_p0, %p169_p2 }
   0x6   : > { %v498_v0 = vld [vmem:[%s589_s1] sm:$0xff] (!%p170_p3)   ;;  %s203_s18 = smul.u32 (!%p170_p3), 3, %s516_s12  ;;  %v499_v1 = vld [vmem:[%s589_s1 + $0x8] sm:$0xff] (!%p170_p3)   ;;  %vm260_vm0 = vcmask (!%p170_p3), 261120  }
   0x7   : > { %173 = sbr.rel (%p170_p3) target bundleno = 239 (0xef), region = 32  ;;  %466 = vmatprep.subr.bf16.mxu0 (!%p170_p3), %v498_v0  ;;  %v442_v5 = vld [vmem:[%s590_s2] ss:$0 sm:$0xff] (!%p170_p3) }
   0x8   : > { %p204_p4 = scmp.lt.s32.totalorder (!%p170_p3), %s203_s18, 5  ;;  %467 = vmatpush3.bf16.msra.mxu0 (!%p170_p3), %v498_v0 }
   0x9   : > { %468 = vmatprep.subr.bf16.mxu0 (!%p170_p3), %v499_v1 }
   0xc   : > { %469 = vmatpush3.bf16.msra.mxu0 (!%p170_p3), %v499_v1 }
   0xe   : > { %s597_s18 = smov (!%p204_p4, %s203_s18), 5 }
   0xf   : > { %s440_s21 = sshll.u32 %s597_s18, 2 }
  0x10   : > { %s207_s24 = scalar_lea.vmem %s588_s0, %s440_s21  ;;  %s223_s29 = scalar_lea.vmem %s591_s3, %s440_s21 }
  0x11   : > { %v500_v2 = vld [vmem:[%s207_s24] sm:$0xff]   ;;  %v501_v3 = vld [vmem:[%s207_s24 + $0x8] ss:$0 sps:$4 sm:$0xff]  }
  0x12   : > { %470 = vmatprep.mubr.msk.bf16.mxu0 %vm260_vm0, %v500_v2 }
  0x13   : > { %471 = vmatmul.mubr.msk.bf16.vlgmr.msra.gmra.mrb[0].mxu0 %vm260_vm0, %v501_v3 }
  0xe6   : > { %v472_v4 = vpop.f32.mrb[0].mxu0 }
  0xe7   : > { %v301_v6 = vpop.f32.mrb[1].mxu0  ;;  %v310_v8 = vadd.f32 %v472_v4, %v442_v5 }
  0xe8   : > { %v473_v7 = vpop.f32.mrb[2].mxu0  ;;  %v302_v10 = vadd.f32 %v442_v5, %v301_v6 }
  0xe9   : > { %v304_v9 = vpop.f32.mrb[3].mxu0  ;;  %v456_v13 = vpack.c.bf16 %v310_v8, %v310_v8 }
  0xea   : > { %v305_v11 = vadd.f32 %v442_v5, %v304_v9 }
  0xeb   : > { %330 = vst [vmem:[%s223_s29 + $0x8] sm:$0xf] %v456_v13 }
  0xec   : > { %v460_v12 = vpack.c.bf16 %v305_v11, %v302_v10 }
  0xee   : > { %461 = vst [vmem:[%s223_s29] sm:$0xff] %v460_v12  }
  0xef PF: > { %s13_s14 = sadd.s32 1, %s524_s14   ;;  %s592_s12 = smov %s520_s13 }
  0xf0   : > { %p10_p5 = scmp.ge.s32.totalorder %s13_s14, 4   ;;  %s593_s13 = smov %s595_s15 }
  0xf2   :  { %12 = sbr.rel (!%p10_p5) target bundleno = 2 (0x2), region = 68 }

// kernel: cap_model_forward.4
= control target key start
LH: loop header
LB: loop body
LE: loop exit
PB: predicated region body
PF: predicated region fallthrough
CT: control target
= control target key end

     0   :  { %v536_v1 = vmov 0   ;;  %vm126_vm0 = vcmask 523264   ;;  %v537_v25 = vmov 1   ;;  %v538_v26 = vmov 2   ;;  %s652_s2 = inlined_call_operand.vmem [shape: bf16[64,128], index: 2, kind: input, shape index: {}]   ;;  %s653_s0 = inlined_call_operand.vmem [shape: f32[64,64], index: 0, kind: input, shape index: {}]   ;;  %s654_s1 = inlined_call_operand.vmem [shape: f32[64,4], index: 1, kind: input, shape index: {}]   ;;  %s655_s3 = inlined_call_operand.vmem [shape: f32[4,128], index: 3, kind: input, shape index: {}]   ;;  %s656_s4 = inlined_call_operand.vmem [shape: f32[1,128], index: 4, kind: input, shape index: {}]   ;;  %s657_s5 = inlined_call_operand.vmem [shape: f32[8,128], index: 5, kind: output, shape index: {}]  }
   0x1   :  { %v532_v0 = vld [vmem:[%s652_s2] sm:$0xff]   ;;  %519 = vset.pattern.permute.xlu1 %v536_v1  ;;  %518 = vset.pattern.permute.xlu0 %v536_v1  ;;  %v533_v2 = vld [vmem:[%s652_s2 + $0x8] sm:$0xff]   ;;  %v534_v3 = vld [vmem:[%s652_s2 + $0x10] sm:$0xff]   ;;  %v539_v27 = vmov 3   ;;  %vm443_vm1 = vcmask 1041409   ;;  %vm446_vm2 = vcmask 1042434  }
   0x2   :  { %490 = vmatprep.subr.bf16.mxu0 %v532_v0  ;;  %506 = vmatprep.subr.bf16.mxu1 %v532_v0  ;;  %v21_v4 = vld [vmem:[%s653_s0] sm:$0xff]  ;;  %v22_v5 = vld [vmem:[%s653_s0 + $0x8] sm:$0xff]  ;;  %v43_v10 = vld [vmem:[%s654_s1 + $0x10] sm:$0xff]  ;;  %vm449_vm3 = vcmask 1043459   ;;  %vm452_vm4 = vcmask 1044484   ;;  %vm455_vm5 = vcmask 1045509  }
   0x3   :  { %491 = vmatpush3.bf16.msra.mxu0 %v532_v0  ;;  %510 = vmatpush3.bf16.msra.mxu1 %v532_v0  ;;  %v25_v6 = vld [vmem:[%s653_s0 + $0x20] sm:$0xff]  ;;  %v29_v7 = vpack.c.bf16 %v22_v5, %v21_v4  ;;  %v26_v8 = vld [vmem:[%s653_s0 + $0x28] sm:$0xff]  ;;  %v535_v11 = vld [vmem:[%s652_s2 + $0x18] sm:$0xff]   ;;  %vm458_vm6 = vcmask 1046534   ;;  %vm461_vm7 = vcmask 1047559  }
   0x4   :  { %492 = vmatprep.subr.bf16.mxu0 %v533_v2  ;;  %507 = vmatprep.subr.bf16.mxu1 %v533_v2  ;;  %v31_v9 = vpack.c.bf16 %v26_v8, %v25_v6  ;;  %v41_v12 = vld [vmem:[%s654_s1] sm:$0xff]  ;;  %v23_v13 = vld [vmem:[%s653_s0 + $0x10] sm:$0xff]  ;;  %v24_v14 = vld [vmem:[%s653_s0 + $0x18] sm:$0xff] }
   0x5   :  { %498 = vmatprep.mubr.msk.bf16.mxu0 %vm126_vm0, %v29_v7  ;;  %v27_v15 = vld [vmem:[%s653_s0 + $0x30] sm:$0xff]  ;;  %62 = vperm.xlu1 %519, %v43_v10   ;;  %v28_v16 = vld [vmem:[%s653_s0 + $0x38] sm:$0xff]  ;;  %v42_v18 = vld [vmem:[%s654_s1 + $0x8] sm:$0xff]  ;;  %v30_v19 = vpack.c.bf16 %v24_v14, %v23_v13 }
   0x6   :  { %502 = vmatprep.mubr.msk.bf16.mxu1 %vm126_vm0, %v31_v9  ;;  %52 = vperm.xlu0 %518, %v41_v12   ;;  %v44_v17 = vld [vmem:[%s654_s1 + $0x18] sm:$0xff]  ;;  %v32_v20 = vpack.c.bf16 %v28_v16, %v27_v15  ;;  %v46_v21 = vld [vmem:[%s654_s1 + $0x28] sm:$0xff]  ;;  %v45_v22 = vld [vmem:[%s654_s1 + $0x20] sm:$0xff] }
   0x7   :  { %493 = vmatpush3.bf16.msra.mxu0 %v533_v2  ;;  %511 = vmatpush3.bf16.msra.mxu1 %v533_v2  ;;  %v48_v23 = vld [vmem:[%s654_s1 + $0x38] sm:$0xff]  ;;  %v47_v24 = vld [vmem:[%s654_s1 + $0x30] sm:$0xff]  ;;  %v469_v56 = vld [vmem:[%s655_s3] ss:$0 sm:$0xff] }
   0x8   :  { %494 = vmatprep.subr.bf16.mxu0 %v534_v3  ;;  %508 = vmatprep.subr.bf16.mxu1 %v534_v3  ;;  %v478_v58 = vld [vmem:[%s655_s3 + $0x1] ss:$0 sm:$0xff]  ;;  %v479_v0 = vld [vmem:[%s655_s3 + $0x2] ss:$0 sm:$0xff]  ;;  %v480_v5 = vld [vmem:[%s655_s3 + $0x3] ss:$0 sm:$0xff] }
   0x9   :  { %67 = vperm.xlu1 %519, %v44_v17  }
   0xa   :  { %57 = vperm.xlu0 %518, %v42_v18  }
   0xb   :  { %495 = vmatpush3.bf16.msra.mxu0 %v534_v3  ;;  %512 = vmatpush3.bf16.msra.mxu1 %v534_v3 }
   0xc   :  { %496 = vmatprep.subr.bf16.mxu0 %v535_v11  ;;  %509 = vmatprep.subr.bf16.mxu1 %v535_v11 }
   0xd   :  { %77 = vperm.xlu1 %519, %v46_v21  }
   0xe   :  { %72 = vperm.xlu0 %518, %v45_v22  }
   0xf   :  { %497 = vmatpush3.bf16.msra.mxu0 %v535_v11  ;;  %513 = vmatpush3.bf16.msra.mxu1 %v535_v11 }
  0x11   :  { %87 = vperm.xlu1 %519, %v48_v23  }
  0x12   :  { %499 = vmatmul.mubr.msk.bf16.vlgmr.msra.gmra.mrb[0].mxu0 %vm126_vm0, %v30_v19  ;;  %503 = vmatmul.mubr.msk.bf16.vlgmr.msra.gmra.mrb[0].mxu1 %vm126_vm0, %v32_v20 }
  0x13   :  { %82 = vperm.xlu0 %518, %v47_v24  }
  0x15   :  { %521 = vset.pattern.permute.xlu1 %v537_v25 }
  0x16   :  { %214 = vperm.xlu1 %521, %v43_v10  }
  0x17   :  { %520 = vset.pattern.permute.xlu0 %v537_v25 }
  0x18   :  { %210 = vperm.xlu0 %520, %v42_v18  }
  0x1a   :  { %206 = vperm.xlu1 %521, %v41_v12  }
  0x1c   :  { %218 = vperm.xlu0 %520, %v44_v17  }
  0x1e   :  { %522 = vset.pattern.permute.xlu1 %v538_v26 }
  0x1f   :  { %263 = vperm.xlu1 %522, %v42_v18  }
  0x20   :  { %222 = vperm.xlu0 %520, %v45_v22  }
  0x23   :  { %267 = vperm.xlu1 %522, %v43_v10  }
  0x24   :  { %226 = vperm.xlu0 %520, %v46_v21  }
  0x27   :  { %259 = vperm.xlu1 %522, %v41_v12  }
  0x28   :  { %234 = vperm.xlu0 %520, %v48_v23  }
  0x2b   :  { %523 = vset.pattern.permute.xlu1 %v539_v27 }
  0x2c   :  { %526 = vset.pattern.permute.xlu0 %v538_v26  ;;  %316 = vperm.xlu1 %523, %v42_v18  }
  0x2d   :  { %271 = vperm.xlu0 %526, %v44_v17  }
  0x30   :  { %524 = vset.pattern.permute.xlu1 %v537_v25 }
  0x31   :  { %275 = vperm.xlu0 %526, %v45_v22   ;;  %230 = vperm.xlu1 %524, %v47_v24  }
  0x35   :  { %287 = vperm.xlu0 %526, %v48_v23   ;;  %525 = vset.pattern.permute.xlu1 %v539_v27 }
  0x36   :  { %320 = vperm.xlu1 %525, %v43_v10  }
  0x39   :  { %531 = vset.pattern.permute.xlu0 %v539_v27 }
  0x3a   :  { %324 = vperm.xlu0 %531, %v44_v17   ;;  %527 = vset.pattern.permute.xlu1 %v538_v26 }
  0x3b   :  { %279 = vperm.xlu1 %527, %v46_v21  }
  0x3e   :  { %340 = vperm.xlu0 %531, %v48_v23  }
  0x3f   :  { %528 = vset.pattern.permute.xlu1 %v539_v27 }
  0x40   :  { %312 = vperm.xlu1 %528, %v41_v12  }
  0x44   :  { %529 = vset.pattern.permute.xlu1 %v538_v26 }
  0x45   :  { %283 = vperm.xlu1 %529, %v47_v24  }
  0x49   :  { %530 = vset.pattern.permute.xlu1 %v539_v27 }
  0x4a   :  { %328 = vperm.xlu1 %530, %v45_v22  }
  0x4e   :  { %332 = vperm.xlu1 %530, %v46_v21  }
  0x52   :  { %336 = vperm.xlu1 %530, %v47_v24  }
  0x84   :  { %v63_v28 = vpop.permute.xlu1 %62 }
  0x85   :  { %v53_v32 = vpop.permute.xlu0 %52  ;;  %v96_v60 = vmul.f32 %v469_v56, %v63_v28 }
  0x86   :  { %v94_v62 = vmul.f32 %v469_v56, %v53_v32 }
  0x88   :  { %v68_v29 = vpop.permute.xlu1 %67 }
  0x89   :  { %v58_v34 = vpop.permute.xlu0 %57  ;;  %v97_v61 = vmul.f32 %v469_v56, %v68_v29 }
  0x8a   :  { %v95_v63 = vmul.f32 %v469_v56, %v58_v34 }
  0x8c   :  { %v78_v30 = vpop.permute.xlu1 %77 }
  0x8d   :  { %v73_v36 = vpop.permute.xlu0 %72  ;;  %v99_v1 = vmul.f32 %v469_v56, %v78_v30 }
  0x8e   :  { %v98_v3 = vmul.f32 %v469_v56, %v73_v36 }
  0x90   :  { %v88_v31 = vpop.permute.xlu1 %87 }
  0x91   :  { %v101_v2 = vmul.f32 %v469_v56, %v88_v31 }
  0x92   :  { %v83_v38 = vpop.permute.xlu0 %82 }
  0x93   :  { %v100_v4 = vmul.f32 %v469_v56, %v83_v38 }
  0x95   :  { %v215_v33 = vpop.permute.xlu1 %214 }
  0x96   :  { %v243_v6 = vmul.f32 %v478_v58, %v215_v33 }
  0x97   :  { %v211_v40 = vpop.permute.xlu0 %210 }
  0x98   :  { %v242_v8 = vmul.f32 %v478_v58, %v211_v40 }
  0x99   :  { %v207_v35 = vpop.permute.xlu1 %206 }
  0x9a   :  { %v241_v7 = vmul.f32 %v478_v58, %v207_v35 }
  0x9b   :  { %v219_v43 = vpop.permute.xlu0 %218 }
  0x9c   :  { %v244_v9 = vmul.f32 %v478_v58, %v219_v43 }
  0x9e   :  { %v264_v37 = vpop.permute.xlu1 %263 }
  0x9f   :  { %v223_v45 = vpop.permute.xlu0 %222  ;;  %v295_v10 = vmul.f32 %v479_v0, %v264_v37 }
  0xa0   :  { %v245_v12 = vmul.f32 %v478_v58, %v223_v45 }
  0xa2   :  { %v268_v39 = vpop.permute.xlu1 %267 }
  0xa3   :  { %v227_v47 = vpop.permute.xlu0 %226  ;;  %v296_v11 = vmul.f32 %v479_v0, %v268_v39 }
  0xa4   :  { %v246_v13 = vmul.f32 %v478_v58, %v227_v47 }
  0xa6   :  { %v260_v41 = vpop.permute.xlu1 %259 }
  0xa7   :  { %v235_v49 = vpop.permute.xlu0 %234  ;;  %v294_v15 = vmul.f32 %v479_v0, %v260_v41 }
  0xa8   :  { %v248_v17 = vmul.f32 %v478_v58, %v235_v49 }
  0xab   :  { %v317_v42 = vpop.permute.xlu1 %316 }
  0xac   :  { %v272_v51 = vpop.permute.xlu0 %271  ;;  %v348_v16 = vmul.f32 %v480_v5, %v317_v42 }
  0xad   :  { %v297_v18 = vmul.f32 %v479_v0, %v272_v51 }
  0xb0   :  { %v231_v44 = vpop.permute.xlu1 %230  ;;  %v276_v53 = vpop.permute.xlu0 %275 }
  0xb1   :  { %v247_v19 = vmul.f32 %v478_v58, %v231_v44  ;;  %v298_v21 = vmul.f32 %v479_v0, %v276_v53 }
  0xb4   :  { %v288_v55 = vpop.permute.xlu0 %287 }
  0xb5   :  { %v321_v46 = vpop.permute.xlu1 %320  ;;  %v301_v22 = vmul.f32 %v479_v0, %v288_v55 }
  0xb6   :  { %v349_v20 = vmul.f32 %v480_v5, %v321_v46 }
  0xb9   :  { %v325_v57 = vpop.permute.xlu0 %324 }
  0xba   :  { %v280_v48 = vpop.permute.xlu1 %279  ;;  %v350_v28 = vmul.f32 %v480_v5, %v325_v57 }
  0xbb   :  { %v299_v24 = vmul.f32 %v479_v0, %v280_v48 }
  0xbd   :  { %v341_v14 = vpop.permute.xlu0 %340 }
  0xbe   :  { %v354_v29 = vmul.f32 %v480_v5, %v341_v14 }
  0xbf   :  { %v313_v50 = vpop.permute.xlu1 %312 }
  0xc0   :  { %v347_v25 = vmul.f32 %v480_v5, %v313_v50 }
  0xc4   :  { %v284_v52 = vpop.permute.xlu1 %283 }
  0xc5   :  { %v300_v30 = vmul.f32 %v479_v0, %v284_v52 }
  0xc9   :  { %v329_v54 = vpop.permute.xlu1 %328 }
  0xca   :  { %v351_v31 = vmul.f32 %v480_v5, %v329_v54 }
  0xcd   :  { %v333_v59 = vpop.permute.xlu1 %332 }
  0xce   :  { %v352_v36 = vmul.f32 %v480_v5, %v333_v59 }
  0xd1   :  { %v337_v23 = vpop.permute.xlu1 %336 }
  0xd2   :  { %v353_v41 = vmul.f32 %v480_v5, %v337_v23 }
  0xe5   :  { %v500_v26 = vpop.f32.mrb[0].mxu0  ;;  %v504_v27 = vpop.f32.mrb[0].mxu1 }
  0xe6   :  { %v182_v32 = vadd.f32 %v500_v26, %v96_v60  ;;  %v198_v33 = vadd.f32 %v504_v27, %v100_v4  ;;  %v173_v34 = vpop.f32.mrb[1].mxu0  ;;  %v189_v35 = vpop.f32.mrb[1].mxu1 }
  0xe7   :  { %v174_v37 = vadd.f32 %v173_v34, %v94_v62  ;;  %v190_v38 = vadd.f32 %v189_v35, %v98_v3  ;;  %v501_v39 = vpop.f32.mrb[2].mxu0  ;;  %v505_v40 = vpop.f32.mrb[2].mxu1 }
  0xe8   :  { %v251_v42 = vadd.f32 %v243_v6, %v182_v32  ;;  %v255_v43 = vadd.f32 %v247_v19, %v198_v33  ;;  %v185_v44 = vadd.f32 %v501_v39, %v97_v61  ;;  %v201_v45 = vadd.f32 %v505_v40, %v101_v2  ;;  %v176_v46 = vpop.f32.mrb[3].mxu0  ;;  %v192_v47 = vpop.f32.mrb[3].mxu1 }
  0xe9   :  { %v249_v48 = vadd.f32 %v241_v7, %v174_v37  ;;  %v253_v49 = vadd.f32 %v245_v12, %v190_v38  ;;  %v177_v50 = vadd.f32 %v176_v46, %v95_v63  ;;  %v193_v51 = vadd.f32 %v192_v47, %v99_v1 }
  0xea   :  { %v304_v52 = vadd.f32 %v296_v11, %v251_v42  ;;  %v252_v53 = vadd.f32 %v244_v9, %v185_v44  ;;  %v256_v54 = vadd.f32 %v248_v17, %v201_v45  ;;  %v308_v55 = vadd.f32 %v300_v30, %v255_v43 }
  0xeb   :  { %v302_v56 = vadd.f32 %v294_v15, %v249_v48  ;;  %v306_v57 = vadd.f32 %v298_v21, %v253_v49  ;;  %v250_v58 = vadd.f32 %v242_v8, %v177_v50  ;;  %v254_v59 = vadd.f32 %v246_v13, %v193_v51 }
  0xec   :  { %v357_v60 = vadd.f32 %v349_v20, %v304_v52  ;;  %v305_v62 = vadd.f32 %v297_v18, %v252_v53  ;;  %v361_v0 = vadd.f32 %v353_v41, %v308_v55  ;;  %v309_v3 = vadd.f32 %v301_v22, %v256_v54  ;;  %v481_v54 = vld [vmem:[%s656_s4] ss:$0 sm:$0xff] }
  0xed   :  { %v355_v61 = vadd.f32 %v347_v25, %v302_v56  ;;  %v359_v2 = vadd.f32 %v351_v31, %v306_v57  ;;  %v303_v4 = vadd.f32 %v295_v10, %v250_v58  ;;  %v307_v5 = vadd.f32 %v299_v24, %v254_v59 }
  0xee   :  { %v375_v6 = vrot.slane %v357_v60, 4  ;;  %v358_v7 = vadd.f32 %v350_v28, %v305_v62  ;;  %v399_v63 = vrot.slane %v361_v0, 4  ;;  %v362_v1 = vadd.f32 %v354_v29, %v309_v3 }
  0xef   :  { %v363_v11 = vrot.slane %v355_v61, 4  ;;  %v387_v9 = vrot.slane %v359_v2, 4  ;;  %v356_v12 = vadd.f32 %v348_v16, %v303_v4  ;;  %v360_v14 = vadd.f32 %v352_v36, %v307_v5 }
  0xf0   :  { %v376_v15 = vadd.f32 %v375_v6, %v357_v60  ;;  %v381_v17 = vrot.slane %v358_v7, 4  ;;  %v400_v8 = vadd.f32 %v399_v63, %v361_v0  ;;  %v405_v13 = vrot.slane %v362_v1, 4 }
  0xf1   :  { %v364_v19 = vadd.f32 %v363_v11, %v355_v61  ;;  %v388_v18 = vadd.f32 %v387_v9, %v359_v2  ;;  %v369_v20 = vrot.slane %v356_v12, 4  ;;  %v393_v21 = vrot.slane %v360_v14, 4 }
  0xf2   :  { %v377_v22 = vrot.slane %v376_v15, 2  ;;  %v382_v23 = vadd.f32 %v381_v17, %v358_v7  ;;  %v401_v10 = vrot.slane %v400_v8, 2  ;;  %v406_v24 = vadd.f32 %v405_v13, %v362_v1 }
  0xf3   :  { %v365_v25 = vrot.slane %v364_v19, 2  ;;  %v389_v26 = vrot.slane %v388_v18, 2  ;;  %v370_v27 = vadd.f32 %v369_v20, %v356_v12  ;;  %v394_v28 = vadd.f32 %v393_v21, %v360_v14 }
  0xf4   :  { %v378_v29 = vadd.f32 %v377_v22, %v376_v15  ;;  %v383_v30 = vrot.slane %v382_v23, 2  ;;  %v402_v16 = vadd.f32 %v401_v10, %v400_v8  ;;  %v407_v31 = vrot.slane %v406_v24, 2 }
  0xf5   :  { %v366_v32 = vadd.f32 %v365_v25, %v364_v19  ;;  %v390_v33 = vadd.f32 %v389_v26, %v388_v18  ;;  %v371_v34 = vrot.slane %v370_v27, 2  ;;  %v395_v35 = vrot.slane %v394_v28, 2 }
  0xf6   :  { %v379_v36 = vrot.slane %v378_v29, 1  ;;  %v384_v37 = vadd.f32 %v383_v30, %v382_v23  ;;  %v403_v38 = vrot.slane %v402_v16, 1  ;;  %v408_v39 = vadd.f32 %v407_v31, %v406_v24 }
  0xf7   :  { %v367_v40 = vrot.slane %v366_v32, 1  ;;  %v391_v41 = vrot.slane %v390_v33, 1  ;;  %v372_v42 = vadd.f32 %v371_v34, %v370_v27  ;;  %v396_v43 = vadd.f32 %v395_v35, %v394_v28 }
  0xf8   :  { %v380_v44 = vadd.f32 %v379_v36, %v378_v29  ;;  %v385_v45 = vrot.slane %v384_v37, 1  ;;  %v409_v46 = vrot.slane %v408_v39, 1  ;;  %v404_v53 = vadd.f32 %v403_v38, %v402_v16 }
  0xf9   :  { %v368_v47 = vadd.f32 %v367_v40, %v366_v32  ;;  %v392_v48 = vadd.f32 %v391_v41, %v390_v33  ;;  %v373_v49 = vrot.slane %v372_v42, 1  ;;  %v397_v50 = vrot.slane %v396_v43, 1 }
  0xfa   :  { %v413_v51 = vmul.f32 0.125, %v380_v44  ;;  %v386_v52 = vadd.f32 %v385_v45, %v384_v37  ;;  %v410_v57 = vadd.f32 %v409_v46, %v408_v39  ;;  %v417_v61 = vmul.f32 0.125, %v404_v53 }
  0xfb   :  { %v374_v55 = vadd.f32 %v373_v49, %v372_v42  ;;  %v398_v56 = vadd.f32 %v397_v50, %v396_v43  ;;  %v415_v58 = vmul.f32 0.125, %v392_v48  ;;  %v411_v60 = vmul.f32 0.125, %v368_v47 }
  0xfc   :  { %v414_v59 = vmul.f32 0.125, %v386_v52  ;;  %v428_v3 = vadd.f32 %v481_v54, %v413_v51  ;;  %v418_v5 = vmul.f32 0.125, %v410_v57  ;;  %v432_v9 = vadd.f32 %v481_v54, %v417_v61 }
  0xfd   :  { %v412_v62 = vmul.f32 0.125, %v374_v55  ;;  %v416_v0 = vmul.f32 0.125, %v398_v56  ;;  %v430_v6 = vadd.f32 %v481_v54, %v415_v58  ;;  %v426_v7 = vadd.f32 %v481_v54, %v411_v60 }
  0xfe   :  { %v429_v2 = vadd.f32 %v481_v54, %v414_v59  ;;  %v445_v11 = vrot.slane %v428_v3, 6  ;;  %v433_v15 = vadd.f32 %v481_v54, %v418_v5  ;;  %v457_v20 = vrot.slane %v432_v9, 2 }
  0xff   :  { %v427_v4 = vadd.f32 %v481_v54, %v412_v62  ;;  %v431_v1 = vadd.f32 %v481_v54, %v416_v0  ;;  %v451_v17 = vrot.slane %v430_v6, 4 }
 0x100   :  { %v448_v12 = vrot.slane %v429_v2, 5  ;;  %v460_v22 = vrot.slane %v433_v15, 1 }
 0x101   :  { %v442_v63 = vrot.slane %v427_v4, 7  ;;  %v454_v13 = vrot.slane %v431_v1, 3 }
 0x103   :  { %v444_v14 = vsel %vm443_vm1, %v442_v63, %v426_v7 }
 0x104   :  { %v447_v8 = vsel %vm446_vm2, %v445_v11, %v444_v14 }
 0x105   :  { %v450_v19 = vsel %vm449_vm3, %v448_v12, %v447_v8 }
 0x106   :  { %v453_v18 = vsel %vm452_vm4, %v451_v17, %v450_v19 }
 0x107   :  { %v456_v21 = vsel %vm455_vm5, %v454_v13, %v453_v18 }
 0x108   :  { %v459_v23 = vsel %vm458_vm6, %v457_v20, %v456_v21 }
 0x109   :  { %v462_v10 = vsel %vm461_vm7, %v460_v22, %v459_v23 }
 0x10a   :  { %464 = vst [vmem:[%s657_s5] sm:$0xff] %v462_v10 }

// kernel: cap_model_forward.3
= control target key start
LH: loop header
LB: loop body
LE: loop exit
PB: predicated region body
PF: predicated region fallthrough
CT: control target
= control target key end

     0   :  { %v372_v0 = vmov 0.0   ;;  %vm373_vm0 = vmmov 0   ;;  %vm61_vm1 = vcmask 261120   ;;  %vm178_vm2 = vcmask 523264   ;;  %s485_s1 = inlined_call_operand.vmem [shape: bf16[32,32], index: 1, kind: input, shape index: {}]   ;;  %s486_s0 = inlined_call_operand.vmem [shape: bf16[8,32], index: 0, kind: input, shape index: {}]   ;;  %s487_s3 = inlined_call_operand.vmem [shape: bf16[32,64], index: 3, kind: input, shape index: {}]   ;;  %s488_s2 = inlined_call_operand.vmem [shape: f32[1,32], index: 2, kind: input, shape index: {}]   ;;  %s489_s4 = inlined_call_operand.vmem [shape: f32[1,64], index: 4, kind: input, shape index: {}]   ;;  %s490_s7 = inlined_call_operand.vmem [shape: bf16[64,128], index: 7, kind: input, shape index: {}]   ;;  %s491_s5 = inlined_call_operand.vmem [shape: f32[1,64], index: 5, kind: input, shape index: {}]   ;;  %s492_s6 = inlined_call_operand.vmem [shape: f32[1,64], index: 6, kind: input, shape index: {}]   ;;  %s493_s8 = inlined_call_operand.vmem [shape: f32[1,128], index: 8, kind: input, shape index: {}]   ;;  %s494_s9 = inlined_call_operand.vmem [shape: f32[8,128], index: 9, kind: output, shape index: {}]  }
   0x1   :  { %328 = vmatprep.subr.bf16.mxu1 %v372_v0  ;;  %v358_v1 = vld [vmem:[%s485_s1] sm:$0xff]   ;;  %332 = vmatprep.mubr.msk.bf16.mxu1 %vm373_vm0, %v372_v0  ;;  %v359_v2 = vld [vmem:[%s485_s1 + $0x8] sm:$0xff]   ;;  %v364_v33 = vld [vmem:[%s490_s7 + $0x10] sm:$0xff]   ;;  %vm210_vm3 = vcmask 519168  }
   0x2   :  { %344 = vmatprep.subr.bf16.mxu0 %v372_v0  ;;  %352 = vmatprep.mubr.msk.bf16.mxu0 %vm373_vm0, %v372_v0  ;;  %v37_v3 = vld [vmem:[%s486_s0] sm:$0xf]  ;;  %v361_v5 = vld [vmem:[%s487_s3 + $0x8] sm:$0xff]   ;;  %v365_v34 = vld [vmem:[%s490_s7 + $0x18] sm:$0xff]  }
   0x3   :  { %329 = vmatpush3.bf16.msra.mxu1 %v358_v1  ;;  %v360_v4 = vld [vmem:[%s487_s3] sm:$0xff]   ;;  %v363_v32 = vld [vmem:[%s490_s7 + $0x8] sm:$0xff]  }
   0x4   :  { %330 = vmatprep.subr.bf16.mxu1 %v372_v0  ;;  %v301_v6 = vld [vmem:[%s488_s2] ss:$0 sm:$0xff] }
   0x5   :  { %v305_v14 = vld [vmem:[%s489_s4] ss:$0 sm:$0xff] }
   0x6   :  { %v362_v31 = vld [vmem:[%s490_s7] sm:$0xff]  }
   0x7   :  { %331 = vmatpush3.bf16.msra.mxu1 %v359_v2  ;;  %345 = vmatpush3.bf16.msra.mxu0 %v362_v31  ;;  %v309_v39 = vld [vmem:[%s491_s5] ss:$0 sm:$0xff] }
   0x8   :  { %336 = vmatprep.subr.bf16.mxu1 %v372_v0  ;;  %346 = vmatprep.subr.bf16.mxu0 %v372_v0  ;;  %v310_v41 = vld [vmem:[%s492_s6] ss:$0 sm:$0xff] }
   0x9   :  { %v311_v46 = vld [vmem:[%s493_s8] ss:$0 sm:$0xff] }
   0xa   :  { %333 = vmatmul.mubr.msk.bf16.vlgmr.msra.gmra.mrb[0].mxu1 %vm61_vm1, %v37_v3 }
   0xb   :  { %340 = vmatprep.mubr.msk.bf16.mxu1 %vm373_vm0, %v372_v0  ;;  %337 = vmatpush3.bf16.msra.mxu1 %v360_v4 }
   0xc   :  { %338 = vmatprep.subr.bf16.mxu1 %v372_v0  ;;  %347 = vmatpush3.bf16.msra.mxu0 %v363_v32 }
   0xd   :  { %348 = vmatprep.subr.bf16.mxu0 %v372_v0 }
   0xf   :  { %339 = vmatpush3.bf16.msra.mxu1 %v361_v5 }
  0x10   :  { %349 = vmatpush3.bf16.msra.mxu0 %v364_v33 }
  0x11   :  { %350 = vmatprep.subr.bf16.mxu0 %v372_v0 }
  0x14   :  { %351 = vmatpush3.bf16.msra.mxu0 %v365_v34 }
  0xdd   :  { %v99_v7 = vpop.f32.mrb[0].mxu1 }
  0xde   :  { %v100_v8 = vadd.f32 %v301_v6, %v99_v7  ;;  %v334_v9 = vpop.f32.mrb[1].mxu1 }
  0xdf   :  { %v102_v10 = vpop.f32.mrb[2].mxu1 }
  0xe0   :  { %366 = vtanh.f32 %v100_v8  ;;  %v335_v11 = vpop.f32.mrb[3].mxu1 }
  0xea   :  { %v367_v12 = vpop.eup %366 }
  0xeb   :  { %v106_v13 = vpack.c.bf16 %v367_v12, %v367_v12 }
  0xed   :  { %341 = vmatmul.mubr.msk.bf16.vlgmr.msra.gmra.mrb[4].mxu1 %vm61_vm1, %v106_v13 }
 0x1c0   :  { %v167_v15 = vpop.f32.mrb[4].mxu1 }
 0x1c1   :  { %v168_v16 = vadd.f32 %v305_v14, %v167_v15  ;;  %v342_v17 = vpop.f32.mrb[5].mxu1 }
 0x1c2   :  { %v170_v18 = vpop.f32.mrb[6].mxu1 }
 0x1c3   :  { %v174_v19 = vmul.f32 0.70710677, %v168_v16  ;;  %v343_v20 = vpop.f32.mrb[7].mxu1  ;;  %v173_v22 = vmul.f32 0.5, %v168_v16 }
 0x1c5   :  { %368 = verf.f32 %v174_v19 }
 0x1cf   :  { %v369_v21 = vpop.eup %368 }
 0x1d0   :  { %v176_v23 = vadd.f32 1.0, %v369_v21 }
 0x1d2   :  { %v177_v24 = vmul.f32 %v176_v23, %v173_v22 }
 0x1d4   :  { %v179_v25 = vsel %vm178_vm2, %v177_v24, 0.0 }
 0x1d5   :  { %180 = vadd.xlane.f32.xlu0 %v179_v25 }
 0x262   :  { %v181_v26 = vpop.xlane.xlu0 %180 }
 0x263   :  { %v183_v27 = vmul.f32 0.015625, %v181_v26 }
 0x265   :  { %v184_v28 = vsub.f32 %v177_v24, %v183_v27 }
 0x267   :  { %v185_v29 = vmul.f32 %v184_v28, %v184_v28 }
 0x269   :  { %v186_v30 = vsel %vm178_vm2, %v185_v29, 0.0 }
 0x26a   :  { %187 = vadd.xlane.f32.xlu0 %v186_v30 }
 0x2f7   :  { %v188_v35 = vpop.xlane.xlu0 %187 }
 0x2f8   :  { %v189_v36 = vmul.f32 0.015625, %v188_v35 }
 0x2fa   :  { %v190_v37 = vadd.f32 1e-12, %v189_v36 }
 0x2fc   :  { %370 = vrsqrt.f32 %v190_v37 }
 0x306   :  { %v371_v38 = vpop.eup %370 }
 0x307   :  { %v192_v40 = vmul.f32 %v371_v38, %v184_v28 }
 0x309   :  { %v200_v42 = vmul.f32 %v309_v39, %v192_v40 }
 0x30b   :  { %v208_v43 = vadd.f32 %v310_v41, %v200_v42 }
 0x30d   :  { %v209_v44 = vpack.c.bf16 %v208_v43, %v208_v43 }
 0x30f   :  { %211 = vst.msk [vmem:[#allocation2] sm:$0xf] %vm210_vm3, %v209_v44 }
 0x316   :  { %v212_v45 = vld [vmem:[#allocation2] sm:$0xf] }
 0x317   :  { %353 = vmatmul.mubr.msk.bf16.vlgmr.msra.gmra.mrb[0].mxu0 %vm178_vm2, %v212_v45 }
 0x3ea   :  { %v290_v47 = vpop.f32.mrb[0].mxu0 }
 0x3eb   :  { %v291_v48 = vadd.f32 %v311_v46, %v290_v47  ;;  %v354_v49 = vpop.f32.mrb[1].mxu0 }
 0x3ec   :  { %v293_v50 = vpop.f32.mrb[2].mxu0 }
 0x3ed   :  { %296 = vst [vmem:[%s494_s9] sm:$0xff] %v291_v48  ;;  %v355_v51 = vpop.f32.mrb[3].mxu0 }

</bundles_post_ra>
